<compile_context>
chip_gen: v5e
topology: v5e:2x2
jax: 0.10.0
libtpu: 0.0.40
codegen_flags: <defaults>
</compile_context>

<pallas_src>
import functools

import jax
import jax.numpy as jnp
from jax.experimental import pallas as pl
from jax.experimental.pallas import tpu as pltpu

MARGIN = 2.0
_COS_EPS = 1e-8          # matches torch cosine_similarity eps
_MIN_TILE = 8            # sublane granule for f32 blocks


def _vmem_plan():
    """Returns (tile_byte_budget, vmem_limit_bytes) for this TPU generation."""
    try:
        cap = int(pltpu.get_tpu_info().vmem_capacity_bytes)
    except Exception:
        cap = 64 * 1024 * 1024                      # assume the smallest part (v7x)
    limit = min((cap * 3) // 4, 96 * 1024 * 1024)   # ~48 MiB v7x, ~96 MiB v5e/v6e
    budget = (limit * 2) // 3                       # headroom for compiler scratch
    return budget, limit


def _choose_tile(batch, dim, itemsize_1, itemsize_2, budget_bytes):
    """Largest tile row-count whose VMEM working set fits in `budget_bytes`."""
    per_row = (
        2 * dim * (itemsize_1 + itemsize_2)   # two inputs, double-buffered, native dtype
        + 5 * dim * 4                         # f32 casts (2) + elementwise products (3)
        + 2 * 128 * 4                         # (tile,1) f32 label block, 2 buffers, lane-padded
        + 2 * 128 * 4                         # (tile,1) f32 output block, 2 buffers, lane-padded
        + 6 * 128 * 4                         # narrow (tile,1) f32 intermediates (dot/s1/s2/cos/...)
    )
    tile = int(budget_bytes // per_row)
    tile = max(_MIN_TILE, (tile // _MIN_TILE) * _MIN_TILE)
    if tile < batch:
        return tile
    # One tile would cover the whole batch.  If the problem is big enough to
    # amortize the ~0.35us/step grid overhead, split it in two so v7x's second
    # TensorCore gets half of the ("parallel") grid; on v5e/v6e (1 TC) the
    # extra step is noise.
    if batch >= 2 * _MIN_TILE and batch * dim * (itemsize_1 + itemsize_2) >= (4 << 20):
        half = ((batch + 1) // 2 + _MIN_TILE - 1) // _MIN_TILE * _MIN_TILE
        return min(half, batch)
    return batch


def _cosine_embedding_loss_kernel(o1_ref, o2_ref, lbl_ref, per_ref, *, margin):
    # Cast after the (native-dtype) DMA; cheap on the VPU.
    o1 = o1_ref[...].astype(jnp.float32)          # (TB, D)
    o2 = o2_ref[...].astype(jnp.float32)          # (TB, D)
    lbl = lbl_ref[...].astype(jnp.float32)        # (TB, 1), labels in {+1, -1}

    # Row-wise cosine similarity: VPU multiplies + lane reductions (no MXU).
    dot = jnp.sum(o1 * o2, axis=-1, keepdims=True)      # (TB, 1)
    s1 = jnp.sum(o1 * o1, axis=-1, keepdims=True)       # (TB, 1)
    s2 = jnp.sum(o2 * o2, axis=-1, keepdims=True)       # (TB, 1)
    # dot / max(||o1||*||o2||, eps)  ==  dot * rsqrt(max(s1*s2, eps^2))
    cos = dot * jax.lax.rsqrt(
        jnp.maximum(s1 * s2, jnp.float32(_COS_EPS * _COS_EPS)))

    # CosineEmbeddingLoss:  y=+1 -> 1 - cos ;  y=-1 -> max(0, cos - margin)
    per_ref[...] = jnp.where(lbl > 0.0, 1.0 - cos, jnp.maximum(cos - margin, 0.0))


def cosine_loss(output_1, output_2, labels, *, margin=MARGIN, tile=None):
    """Matches CosineLoss.forward: returns (loss, loss) as f32 scalars."""
    B, D = output_1.shape
    lbl = labels.reshape(B, 1)                    # keep native dtype; cast in-kernel

    budget, vmem_limit = _vmem_plan()
    if tile is None:
        tile = _choose_tile(
            B, D,
            jnp.dtype(output_1.dtype).itemsize,
            jnp.dtype(output_2.dtype).itemsize,
            budget,
        )
    tile = int(tile)
    num_tiles = -(-B // tile)

    kernel = functools.partial(_cosine_embedding_loss_kernel, margin=float(margin))

    per_row = pl.pallas_call(
        kernel,
        out_shape=jax.ShapeDtypeStruct((B, 1), jnp.float32),
        grid_spec=pltpu.PrefetchScalarGridSpec(
            num_scalar_prefetch=0,
            grid=(num_tiles,),
            in_specs=[
                pl.BlockSpec((tile, D), lambda i: (i, 0)),
                pl.BlockSpec((tile, D), lambda i: (i, 0)),
                pl.BlockSpec((tile, 1), lambda i: (i, 0)),
            ],
            out_specs=pl.BlockSpec((tile, 1), lambda i: (i, 0)),
        ),
        compiler_params=pltpu.CompilerParams(
            dimension_semantics=("parallel",),     # independent tiles -> both TCs on v7x
            vmem_limit_bytes=int(vmem_limit),
        ),
    )(output_1, output_2, lbl)

    # Tiny O(B) epilogue in JAX: mean over the per-row losses (reduction='mean').
    loss = jnp.mean(per_row)
    return loss, loss


def _reference(o1, o2, y, margin=MARGIN):
    """Pure-JAX CosineEmbeddingLoss (reduction='mean') for sanity checking."""
    o1 = o1.astype(jnp.float32)
    o2 = o2.astype(jnp.float32)
    y = y.astype(jnp.float32)
    dot = jnp.sum(o1 * o2, axis=1)
    n1 = jnp.linalg.norm(o1, axis=1)
    n2 = jnp.linalg.norm(o2, axis=1)
    cos = dot / jnp.maximum(n1 * n2, _COS_EPS)
    per = jnp.where(y > 0, 1.0 - cos, jnp.maximum(cos - margin, 0.0))
    return jnp.mean(per)


if __name__ == "__main__":
    key = jax.random.PRNGKey(0)
    k1, k2, k3, k4, k5, k6, k7, k8, k9 = jax.random.split(key, 9)

    # small shapes consistent with the module: batches of embedding pairs + ±1 labels
    B, D = 8, 32
    output_1 = jax.random.normal(k1, (B, D), dtype=jnp.float32)
    output_2 = jax.random.normal(k2, (B, D), dtype=jnp.float32)
    labels = jnp.where(jax.random.bernoulli(k3, 0.5, (B,)), 1.0, -1.0).astype(jnp.float32)

    loss_a, loss_b = jax.block_until_ready(cosine_loss(output_1, output_2, labels))
    ref = _reference(output_1, output_2, labels)
    assert jnp.allclose(loss_a, ref, atol=1e-5, rtol=1e-5), (loss_a, ref)
    assert jnp.allclose(loss_b, ref, atol=1e-5, rtol=1e-5), (loss_b, ref)

    # multi-step parallel grid + partial last tile (B not a multiple of tile)
    B2 = 20
    o1b = jax.random.normal(k4, (B2, D), dtype=jnp.float32)
    o2b = jax.random.normal(k5, (B2, D), dtype=jnp.float32)
    lblb = jnp.where(jax.random.bernoulli(k6, 0.5, (B2,)), 1.0, -1.0).astype(jnp.float32)

    loss2, _ = jax.block_until_ready(cosine_loss(o1b, o2b, lblb, tile=8))
    ref2 = _reference(o1b, o2b, lblb)
    assert jnp.allclose(loss2, ref2, atol=1e-5, rtol=1e-5), (loss2, ref2)

    # native-dtype (bf16) DMA path with the default VMEM-budgeted tile
    B3, D3 = 16, 128
    o1c = jax.random.normal(k7, (B3, D3), dtype=jnp.bfloat16)
    o2c = jax.random.normal(k8, (B3, D3), dtype=jnp.bfloat16)
    lblc = jnp.where(jax.random.bernoulli(k9, 0.5, (B3,)), 1.0, -1.0).astype(jnp.float32)

    loss3, _ = jax.block_until_ready(cosine_loss(o1c, o2c, lblc))
    ref3 = _reference(o1c, o2c, lblc)
    assert jnp.allclose(loss3, ref3, atol=1e-4, rtol=1e-4), (loss3, ref3)

    print("KERNEL_OK")
</pallas_src>

<mosaic_0001>
module attributes {stable_mosaic.version = 11 : i64} {
  func.func @_cosine_embedding_loss_kernel(%arg0: i32, %arg1: memref<8x32xf32, #tpu.memory_space<vmem>>, %arg2: memref<8x32xf32, #tpu.memory_space<vmem>>, %arg3: memref<8x1xf32, #tpu.memory_space<vmem>>, %arg4: memref<8x1xf32, #tpu.memory_space<vmem>>) attributes {dimension_semantics = [#tpu.dimension_semantics<parallel>], iteration_bounds = array<i64: 1>, scalar_prefetch = 0 : i64, scratch_operands = 0 : i64, tpu.core_type = #tpu.core_type<tc>, window_params = [{transform_indices = @transform_0, window_bounds = array<i64: 8, 32>}, {transform_indices = @transform_1, window_bounds = array<i64: 8, 32>}, {transform_indices = @transform_2, window_bounds = array<i64: 8, 1>}, {transform_indices = @transform_3, window_bounds = array<i64: 8, 1>}]} {
    %c0 = arith.constant 0 : index
    %c0_0 = arith.constant 0 : index
    %0 = vector.load %arg1[%c0, %c0_0] : memref<8x32xf32, #tpu.memory_space<vmem>>, vector<8x32xf32>
    %c0_1 = arith.constant 0 : index
    %c0_2 = arith.constant 0 : index
    %1 = vector.load %arg2[%c0_1, %c0_2] : memref<8x32xf32, #tpu.memory_space<vmem>>, vector<8x32xf32>
    %c0_3 = arith.constant 0 : index
    %c0_4 = arith.constant 0 : index
    %2 = vector.load %arg3[%c0_3, %c0_4] : memref<8x1xf32, #tpu.memory_space<vmem>>, vector<8x1xf32>
    %3 = arith.mulf %0, %1 : vector<8x32xf32>
    %cst = arith.constant dense<0.000000e+00> : vector<8xf32>
    %4 = vector.multi_reduction <add>, %3, %cst [1] : vector<8x32xf32> to vector<8xf32>
    %5 = vector.shape_cast %4 : vector<8xf32> to vector<8x1xf32>
    %6 = arith.mulf %0, %0 : vector<8x32xf32>
    %cst_5 = arith.constant dense<0.000000e+00> : vector<8xf32>
    %7 = vector.multi_reduction <add>, %6, %cst_5 [1] : vector<8x32xf32> to vector<8xf32>
    %8 = vector.shape_cast %7 : vector<8xf32> to vector<8x1xf32>
    %9 = arith.mulf %1, %1 : vector<8x32xf32>
    %cst_6 = arith.constant dense<0.000000e+00> : vector<8xf32>
    %10 = vector.multi_reduction <add>, %9, %cst_6 [1] : vector<8x32xf32> to vector<8xf32>
    %11 = vector.shape_cast %10 : vector<8xf32> to vector<8x1xf32>
    %12 = arith.mulf %8, %11 : vector<8x1xf32>
    %cst_7 = arith.constant 1.000000e-16 : f32
    %13 = vector.broadcast %cst_7 : f32 to vector<8x1xf32>
    %14 = arith.maximumf %12, %13 : vector<8x1xf32>
    %15 = math.rsqrt %14 : vector<8x1xf32>
    %16 = arith.mulf %5, %15 : vector<8x1xf32>
    %cst_8 = arith.constant 0.000000e+00 : f32
    %17 = vector.broadcast %cst_8 : f32 to vector<8x1xf32>
    %18 = arith.cmpf ogt, %2, %17 : vector<8x1xf32>
    %cst_9 = arith.constant 1.000000e+00 : f32
    %19 = vector.broadcast %cst_9 : f32 to vector<8x1xf32>
    %20 = arith.subf %19, %16 : vector<8x1xf32>
    %cst_10 = arith.constant 2.000000e+00 : f32
    %21 = vector.broadcast %cst_10 : f32 to vector<8x1xf32>
    %22 = arith.subf %16, %21 : vector<8x1xf32>
    %cst_11 = arith.constant 0.000000e+00 : f32
    %23 = vector.broadcast %cst_11 : f32 to vector<8x1xf32>
    %24 = arith.maximumf %22, %23 : vector<8x1xf32>
    %25 = arith.select %18, %20, %24 : vector<8x1xi1>, vector<8x1xf32>
    %c0_12 = arith.constant 0 : index
    %c0_13 = arith.constant 0 : index
    %26 = vector.load %arg4[%c0_12, %c0_13] : memref<8x1xf32, #tpu.memory_space<vmem>>, vector<8x1xf32>
    tpu.vector_store %arg4[%c0_12, %c0_13], %25 {strides = array<i32>} : memref<8x1xf32, #tpu.memory_space<vmem>>, vector<8x1xf32>,
    return
  }
  func.func @transform_0(%arg0: i32) -> (i32, i32) {
    %c0_i32 = arith.constant 0 : i32
    %c0_i32_0 = arith.constant 0 : i32
    return %arg0, %c0_i32 : i32, i32
  }
  func.func @transform_1(%arg0: i32) -> (i32, i32) {
    %c0_i32 = arith.constant 0 : i32
    %c0_i32_0 = arith.constant 0 : i32
    return %arg0, %c0_i32 : i32, i32
  }
  func.func @transform_2(%arg0: i32) -> (i32, i32) {
    %c0_i32 = arith.constant 0 : i32
    %c0_i32_0 = arith.constant 0 : i32
    return %arg0, %c0_i32 : i32, i32
  }
  func.func @transform_3(%arg0: i32) -> (i32, i32) {
    %c0_i32 = arith.constant 0 : i32
    %c0_i32_0 = arith.constant 0 : i32
    return %arg0, %c0_i32 : i32, i32
  }
}

</mosaic_0001>

<bundles_post_ra>
// kernel: tpu_custom_call.1
= control target key start
LH: loop header
LB: loop body
LE: loop exit
PB: predicated region body
PF: predicated region fallthrough
CT: control target
= control target key end

     0   :  { %8 = vsyncpa [#allocation3], 0  ;;  %s99_s15 = smov [#allocation2]   ;;  %s132_s0 = inlined_call_operand.vmem [shape: f32[8,32], index: 0, kind: input, shape index: {}]   ;;  %s133_s1 = inlined_call_operand.hbm [shape: f32[8,32], index: 1, kind: input, shape index: {}]   ;;  %s134_s2 = inlined_call_operand.vmem [shape: f32[8,1], index: 2, kind: input, shape index: {}]   ;;  %s135_s3 = inlined_call_operand.vmem [shape: f32[8,1], index: 3, kind: output, shape index: {}]  }
   0x1   :  { %s16_s14 = sshll.u32 %s133_s1, 4  ;;  %s18_s16 = sshll.u32 %s99_s15, 4  ;;  %s17_s14 = int_to_ptr.hbm [resolvable:$true] %s16_s14  ;;  %s19_s16 = int_to_ptr.vmem [resolvable:$true] %s18_s16 }
   0x2   :  { %21 = dma.hbm_to_vmem [thread:$0]  %s17_s14, 128, %s19_s16, [#allocation3]  }
   0x3   :  { %97 = dma.done.wait [#allocation3], 128  }
   0x4   :  { %98 = vsyncadd [#allocation3], 4294967168  ;;  %v28_v0 = vld [vmem:[%s132_s0] sm:$0xff]  ;;  %vm32_vm0 = vcmask 261120   ;;  %vm62_vm5 = vcmask 7168  }
   0x5   :  { %v29_v1 = vld [vmem:[#allocation2] sm:$0xff]  ;;  %v36_v2 = vmul.f32 %v28_v0, %v28_v0 }
   0x6   :  { %v31_v3 = vmul.f32 %v29_v1, %v28_v0  ;;  %v40_v6 = vmul.f32 %v29_v1, %v29_v1  ;;  %v30_v20 = vld [vmem:[%s134_s2] sm:$0xff] }
   0x7   :  { %v37_v4 = vsel %vm32_vm0, %v36_v2, 0.0  ;;  %vm57_vm4 = vcmp.gt.f32.partialorder %v30_v20, 0.0 }
   0x8   :  { %v33_v5 = vsel %vm32_vm0, %v31_v3, 0.0  ;;  %38 = vadd.xlane.f32.xlu0 %v37_v4  ;;  %v41_v7 = vsel %vm32_vm0, %v40_v6, 0.0 }
   0x9   :  { %34 = vadd.xlane.f32.xlu1 %v33_v5 }
  0x10   :  { %42 = vadd.xlane.f32.xlu0 %v41_v7 }
  0x7b   :  { %v39_v8 = vpop.xlane.xlu0 %38 }
  0x7c   :  { %v35_v18 = vpop.xlane.xlu1 %34 }
  0x83   :  { %v43_v9 = vpop.xlane.xlu0 %42 }
  0x84   :  { %v44_v10 = vmul.f32 %v43_v9, %v39_v8 }
  0x86   :  { %v45_v11 = vmax.f32 %v44_v10, 1e-16 }
  0x88   :  { %71 = vrsqrt.f32 %v45_v11  ;;  %vm52_vm2 = vweird.f32 %v45_v11 }
  0x8e   :  { %v72_v12 = vpop.eup %71 }
  0x8f   :  { %v47_v13 = vmul.f32 %v72_v12, %v45_v11  ;;  %vm53_vm1 = vweird.f32 %v72_v12 }
  0x90   :  { %vm54_vm3 = vmor %vm52_vm2, %vm53_vm1 }
  0x91   :  { %v48_v14 = vmul.f32 %v72_v12, %v47_v13 }
  0x93   :  { %v49_v15 = vmul.f32 0.5, %v48_v14 }
  0x95   :  { %v50_v16 = vsub.f32 1.5, %v49_v15 }
  0x97   :  { %v51_v17 = vmul.f32 %v72_v12, %v50_v16 }
  0x99   :  { %v55_v19 = vsel %vm54_vm3, %v72_v12, %v51_v17 }
  0x9a   :  { %v56_v21 = vmul.f32 %v55_v19, %v35_v18 }
  0x9c   :  { %v69_v22 = vadd.f32 -2.0, %v56_v21  ;;  %v58_v23 = vsub.f32 1.0, %v56_v21 }
  0x9e   :  { %v60_v24 = vmax.f32 %v69_v22, 0.0 }
  0xa0   :  { %v61_v25 = vsel %vm57_vm4, %v58_v23, %v60_v24 }
  0xa1   :  { %63 = vst.msk [vmem:[%s135_s3] sm:$0xff] %vm62_vm5, %v61_v25 }
  0xa2   :  { %68 = vsyncpa [#allocation3], 1 }

</bundles_post_ra>
